<compile_context>
chip_gen: v5e
topology: v5e:2x2
jax: 0.10.0
libtpu: 0.0.40
codegen_flags: <defaults>
</compile_context>

<pallas_src>
import functools

import jax
import jax.numpy as jnp
from jax.experimental import pallas as pl
from jax.experimental.pallas import tpu as pltpu

EPS = 1e-5  # torch.nn.LayerNorm default


def _stack_ln_kernel(x_ref, g_ref, b_ref, o_ref, *, c):
    # x_ref: (2C, tHW).  Rows [0, c) are the "v" stack, rows [c, 2c) are the
    # "h" stack.  Each lane (spatial position) is normalized per half over its
    # c sublanes.  Masked sums keep everything on full sublane tiles (no
    # sub-8-row slicing / relayout).
    x = x_ref[...].astype(jnp.float32)                       # (2C, tHW)
    row = jax.lax.broadcasted_iota(jnp.int32, x.shape, 0)    # sublane index
    is_v = row < c
    inv_c = 1.0 / c

    sum_v = jnp.sum(jnp.where(is_v, x, 0.0), axis=0, keepdims=True)   # (1, tHW)
    sum_h = jnp.sum(jnp.where(is_v, 0.0, x), axis=0, keepdims=True)
    mean = jnp.where(is_v, sum_v * inv_c, sum_h * inv_c)              # (2C, tHW)

    xc = x - mean
    xc2 = xc * xc
    var_v = jnp.sum(jnp.where(is_v, xc2, 0.0), axis=0, keepdims=True) * inv_c
    var_h = jnp.sum(jnp.where(is_v, 0.0, xc2), axis=0, keepdims=True) * inv_c
    inv = jax.lax.rsqrt(jnp.where(is_v, var_v, var_h) + EPS)  # biased var (torch)

    g = g_ref[...].astype(jnp.float32)                       # (2C, 1) -> lanes
    b = b_ref[...].astype(jnp.float32)
    o_ref[...] = (xc * inv * g + b).astype(o_ref.dtype)


def _sublane_tile(itemsize):
    # f32 -> 8 sublanes, bf16/f16 -> 16, int8/fp8 -> 32.
    return {4: 8, 2: 16, 1: 32}.get(itemsize, 8)


def _tile_and_vmem(hw, c2, itemsize, n):
    """Pick (thw, vmem_limit_bytes) from a per-generation VMEM budget.

    thw is a multiple of 128 (or the full HW extent); no divisibility
    requirement -- the grid uses pl.cdiv and the ragged last block is masked.
    Budget math uses the sublane-padded channel count and 4 B/elem (f32
    compute temporaries) so bf16 / small-C inputs don't under-count VMEM.
    """
    try:
        kind = jax.devices()[0].device_kind.lower()
    except Exception:
        kind = ""
    if "v6" in kind:
        # 128 MiB physical VMEM: bigger tiles are a small free win.
        budget, vmem_limit = 8 << 20, 64 << 20
    else:
        # v5e (16 MiB scoped default -> raise to 32) and v7x (only 64 MiB
        # physical per TC): stay conservative.
        budget, vmem_limit = 4 << 20, 32 << 20

    sub = _sublane_tile(itemsize)
    c_pad = ((c2 + sub - 1) // sub) * sub
    thw = (budget // (c_pad * 4)) // 128 * 128
    thw = max(thw, 128)
    if thw >= hw:
        thw = hw  # full-extent block is always legal, even if HW % 128 != 0

    # v7x megacore: make sure there are >= 2 parallel grid points so both
    # TensorCores get work (no-op on v5e/v6e's single TC).
    num_sp = (hw + thw - 1) // thw
    if n * num_sp < 2 and hw >= 256:
        thw = max(128, ((hw + 1) // 2 + 127) // 128 * 128)

    return thw, vmem_limit


@functools.partial(jax.jit, static_argnames=("c", "thw", "vmem_limit"))
def _stack_layer_norm_3d(x3, gamma, beta, *, c, thw, vmem_limit):
    # x3: (N, 2C, HW); gamma/beta: (2C, 1) float32.
    n, c2, hw = x3.shape
    # Grid order pinned: (N, spatial), spatial innermost -> contiguous HBM
    # streaming + gamma/beta (index_map independent of the spatial axis) stay
    # VMEM-resident across all spatial tiles of an image.
    grid = (n, pl.cdiv(hw, thw))
    kernel = functools.partial(_stack_ln_kernel, c=c)
    return pl.pallas_call(
        kernel,
        out_shape=jax.ShapeDtypeStruct(x3.shape, x3.dtype),
        grid_spec=pltpu.PrefetchScalarGridSpec(
            num_scalar_prefetch=0,
            grid=grid,
            in_specs=[
                # activation: squeeze N, kernel sees (2C, tHW)
                pl.BlockSpec((None, c2, thw), lambda i, t: (i, 0, t)),
                # stacked per-half affine params, kernel sees (2C, 1)
                pl.BlockSpec((c2, 1), lambda i, t: (0, 0)),
                pl.BlockSpec((c2, 1), lambda i, t: (0, 0)),
            ],
            out_specs=pl.BlockSpec((None, c2, thw), lambda i, t: (i, 0, t)),
        ),
        # In-place: output has the same shape/dtype and identical block map as
        # input 0; avoids a separate HBM output allocation.
        input_output_aliases={0: 0},
        compiler_params=pltpu.CompilerParams(
            # Every block is independent (no reduction grid axis) -> all
            # parallel; lets v7x shard across its 2 TensorCores.
            dimension_semantics=("parallel", "parallel"),
            vmem_limit_bytes=vmem_limit,
        ),
    )(x3, gamma, beta)


def stack_layer_norm(x, gamma_v, beta_v, gamma_h, beta_h):
    """x: (N, 2*n_filters, H, W) NCHW. Returns same shape/dtype."""
    n, c2, h, w = x.shape
    assert c2 % 2 == 0
    c = c2 // 2
    hw = h * w

    # Contiguous reshape: NCHW -> (N, 2C, H*W). No data movement.
    x3 = x.reshape(n, c2, hw)
    # chunk(2, dim=1): rows [0, C) use v_layer_norm, rows [C, 2C) h_layer_norm.
    gamma = jnp.concatenate([gamma_v, gamma_h]).reshape(c2, 1).astype(jnp.float32)
    beta = jnp.concatenate([beta_v, beta_h]).reshape(c2, 1).astype(jnp.float32)

    thw, vmem_limit = _tile_and_vmem(hw, c2, jnp.dtype(x.dtype).itemsize, n)
    y3 = _stack_layer_norm_3d(x3, gamma, beta, c=c, thw=thw, vmem_limit=vmem_limit)
    return y3.reshape(n, c2, h, w)


def _reference(x, gamma_v, beta_v, gamma_h, beta_h):
    # Pure-JAX reference of the PyTorch forward.
    n, c2, h, w = x.shape
    c = c2 // 2

    def ln(half, g, b):
        hn = jnp.transpose(half, (0, 2, 3, 1))  # NHWC
        mean = jnp.mean(hn, axis=-1, keepdims=True)
        var = jnp.mean((hn - mean) ** 2, axis=-1, keepdims=True)
        y = (hn - mean) / jnp.sqrt(var + EPS) * g + b
        return jnp.transpose(y, (0, 3, 1, 2))

    return jnp.concatenate(
        [ln(x[:, :c], gamma_v, beta_v), ln(x[:, c:], gamma_h, beta_h)], axis=1
    )


if __name__ == "__main__":
    n_filters = 4
    N, H, W = 2, 16, 16
    key = jax.random.PRNGKey(0)
    kx, kgv, kgh = jax.random.split(key, 3)

    # Input: (N, 2*n_filters, H, W), as implied by chunk(2, dim=1).
    x = jax.random.normal(kx, (N, 2 * n_filters, H, W), dtype=jnp.float32)

    # nn.LayerNorm defaults (weight=1, bias=0) plus small deterministic
    # perturbations so gamma/beta actually matter.
    gamma_v = jnp.ones((n_filters,), jnp.float32) + 0.1 * jax.random.normal(
        kgv, (n_filters,), dtype=jnp.float32
    )
    beta_v = jnp.zeros((n_filters,), jnp.float32) + 0.05
    gamma_h = jnp.ones((n_filters,), jnp.float32) + 0.1 * jax.random.normal(
        kgh, (n_filters,), dtype=jnp.float32
    )
    beta_h = jnp.zeros((n_filters,), jnp.float32) - 0.05

    out = stack_layer_norm(x, gamma_v, beta_v, gamma_h, beta_h)
    out = jax.block_until_ready(out)

    ref = _reference(x, gamma_v, beta_v, gamma_h, beta_h)
    assert out.shape == x.shape and out.dtype == x.dtype
    err = float(jnp.max(jnp.abs(out - ref)))
    assert err < 1e-4, err

    print("KERNEL_OK")
</pallas_src>

<mosaic_0001>
module attributes {stable_mosaic.version = 11 : i64} {
  func.func @_stack_ln_kernel(%arg0: i32, %arg1: i32, %arg2: memref<1x8x256xf32, #tpu.memory_space<vmem>>, %arg3: memref<8x1xf32, #tpu.memory_space<vmem>>, %arg4: memref<8x1xf32, #tpu.memory_space<vmem>>, %arg5: memref<1x8x256xf32, #tpu.memory_space<vmem>>) attributes {dimension_semantics = [#tpu.dimension_semantics<parallel>, #tpu.dimension_semantics<parallel>], iteration_bounds = array<i64: 2, 1>, scalar_prefetch = 0 : i64, scratch_operands = 0 : i64, tpu.core_type = #tpu.core_type<tc>, window_params = [{transform_indices = @transform_0, window_bounds = array<i64: 1, 8, 256>}, {pipeline_mode = #tpu.pipeline_mode<synchronous>, transform_indices = @transform_1, window_bounds = array<i64: 8, 1>}, {pipeline_mode = #tpu.pipeline_mode<synchronous>, transform_indices = @transform_2, window_bounds = array<i64: 8, 1>}, {transform_indices = @transform_3, window_bounds = array<i64: 1, 8, 256>}]} {
    %c0 = arith.constant 0 : index
    %c0_0 = arith.constant 0 : index
    %c0_1 = arith.constant 0 : index
    %0 = vector.load %arg2[%c0, %c0_0, %c0_1] : memref<1x8x256xf32, #tpu.memory_space<vmem>>, vector<1x8x256xf32>
    %1 = vector.shape_cast %0 : vector<1x8x256xf32> to vector<8x256xf32>
    %2 = tpu.iota {dimensions = array<i32: 0>} : vector<8x256xi32>
    %c4_i32 = arith.constant 4 : i32
    %3 = vector.broadcast %c4_i32 : i32 to vector<8x256xi32>
    %4 = arith.cmpi slt, %2, %3 : vector<8x256xi32>
    %cst = arith.constant 0.000000e+00 : f32
    %5 = vector.broadcast %cst : f32 to vector<8x256xf32>
    %6 = arith.select %4, %1, %5 : vector<8x256xi1>, vector<8x256xf32>
    %cst_2 = arith.constant dense<0.000000e+00> : vector<256xf32>
    %7 = vector.multi_reduction <add>, %6, %cst_2 [0] : vector<8x256xf32> to vector<256xf32>
    %8 = vector.shape_cast %7 : vector<256xf32> to vector<1x256xf32>
    %cst_3 = arith.constant 0.000000e+00 : f32
    %9 = vector.broadcast %cst_3 : f32 to vector<8x256xf32>
    %10 = arith.select %4, %9, %1 : vector<8x256xi1>, vector<8x256xf32>
    %cst_4 = arith.constant dense<0.000000e+00> : vector<256xf32>
    %11 = vector.multi_reduction <add>, %10, %cst_4 [0] : vector<8x256xf32> to vector<256xf32>
    %12 = vector.shape_cast %11 : vector<256xf32> to vector<1x256xf32>
    %cst_5 = arith.constant 2.500000e-01 : f32
    %13 = vector.broadcast %cst_5 : f32 to vector<1x256xf32>
    %14 = arith.mulf %8, %13 : vector<1x256xf32>
    %cst_6 = arith.constant 2.500000e-01 : f32
    %15 = vector.broadcast %cst_6 : f32 to vector<1x256xf32>
    %16 = arith.mulf %12, %15 : vector<1x256xf32>
    %17 = vector.shape_cast %14 : vector<1x256xf32> to vector<1x256xf32>
    %18 = vector.broadcast %17 : vector<1x256xf32> to vector<8x256xf32>
    %19 = vector.shape_cast %16 : vector<1x256xf32> to vector<1x256xf32>
    %20 = vector.broadcast %19 : vector<1x256xf32> to vector<8x256xf32>
    %21 = arith.select %4, %18, %20 : vector<8x256xi1>, vector<8x256xf32>
    %22 = arith.subf %1, %21 : vector<8x256xf32>
    %23 = arith.mulf %22, %22 : vector<8x256xf32>
    %cst_7 = arith.constant 0.000000e+00 : f32
    %24 = vector.broadcast %cst_7 : f32 to vector<8x256xf32>
    %25 = arith.select %4, %23, %24 : vector<8x256xi1>, vector<8x256xf32>
    %cst_8 = arith.constant dense<0.000000e+00> : vector<256xf32>
    %26 = vector.multi_reduction <add>, %25, %cst_8 [0] : vector<8x256xf32> to vector<256xf32>
    %27 = vector.shape_cast %26 : vector<256xf32> to vector<1x256xf32>
    %cst_9 = arith.constant 2.500000e-01 : f32
    %28 = vector.broadcast %cst_9 : f32 to vector<1x256xf32>
    %29 = arith.mulf %27, %28 : vector<1x256xf32>
    %cst_10 = arith.constant 0.000000e+00 : f32
    %30 = vector.broadcast %cst_10 : f32 to vector<8x256xf32>
    %31 = arith.select %4, %30, %23 : vector<8x256xi1>, vector<8x256xf32>
    %cst_11 = arith.constant dense<0.000000e+00> : vector<256xf32>
    %32 = vector.multi_reduction <add>, %31, %cst_11 [0] : vector<8x256xf32> to vector<256xf32>
    %33 = vector.shape_cast %32 : vector<256xf32> to vector<1x256xf32>
    %cst_12 = arith.constant 2.500000e-01 : f32
    %34 = vector.broadcast %cst_12 : f32 to vector<1x256xf32>
    %35 = arith.mulf %33, %34 : vector<1x256xf32>
    %36 = vector.shape_cast %29 : vector<1x256xf32> to vector<1x256xf32>
    %37 = vector.broadcast %36 : vector<1x256xf32> to vector<8x256xf32>
    %38 = vector.shape_cast %35 : vector<1x256xf32> to vector<1x256xf32>
    %39 = vector.broadcast %38 : vector<1x256xf32> to vector<8x256xf32>
    %40 = arith.select %4, %37, %39 : vector<8x256xi1>, vector<8x256xf32>
    %cst_13 = arith.constant 9.99999974E-6 : f32
    %41 = vector.broadcast %cst_13 : f32 to vector<8x256xf32>
    %42 = arith.addf %40, %41 : vector<8x256xf32>
    %43 = math.rsqrt %42 : vector<8x256xf32>
    %c0_14 = arith.constant 0 : index
    %c0_15 = arith.constant 0 : index
    %44 = vector.load %arg3[%c0_14, %c0_15] : memref<8x1xf32, #tpu.memory_space<vmem>>, vector<8x1xf32>
    %c0_16 = arith.constant 0 : index
    %c0_17 = arith.constant 0 : index
    %45 = vector.load %arg4[%c0_16, %c0_17] : memref<8x1xf32, #tpu.memory_space<vmem>>, vector<8x1xf32>
    %46 = arith.mulf %22, %43 : vector<8x256xf32>
    %47 = vector.broadcast %44 : vector<8x1xf32> to vector<8x256xf32>
    %48 = arith.mulf %46, %47 : vector<8x256xf32>
    %49 = vector.broadcast %45 : vector<8x1xf32> to vector<8x256xf32>
    %50 = arith.addf %48, %49 : vector<8x256xf32>
    %c0_18 = arith.constant 0 : index
    %c0_19 = arith.constant 0 : index
    %c0_20 = arith.constant 0 : index
    %51 = vector.load %arg5[%c0_18, %c0_19, %c0_20] : memref<1x8x256xf32, #tpu.memory_space<vmem>>, vector<1x8x256xf32>
    %52 = vector.shape_cast %51 : vector<1x8x256xf32> to vector<8x256xf32>
    %53 = vector.shape_cast %50 : vector<8x256xf32> to vector<1x8x256xf32>
    tpu.vector_store %arg5[%c0_18, %c0_19, %c0_20], %53 {strides = array<i32>} : memref<1x8x256xf32, #tpu.memory_space<vmem>>, vector<1x8x256xf32>,
    return
  }
  func.func @transform_0(%arg0: i32, %arg1: i32) -> (i32, i32, i32) {
    %c0_i32 = arith.constant 0 : i32
    %c0_i32_0 = arith.constant 0 : i32
    return %arg0, %c0_i32, %arg1 : i32, i32, i32
  }
  func.func @transform_1(%arg0: i32, %arg1: i32) -> (i32, i32) {
    %c0_i32 = arith.constant 0 : i32
    %c0_i32_0 = arith.constant 0 : i32
    %c0_i32_1 = arith.constant 0 : i32
    return %c0_i32, %c0_i32_0 : i32, i32
  }
  func.func @transform_2(%arg0: i32, %arg1: i32) -> (i32, i32) {
    %c0_i32 = arith.constant 0 : i32
    %c0_i32_0 = arith.constant 0 : i32
    %c0_i32_1 = arith.constant 0 : i32
    return %c0_i32, %c0_i32_0 : i32, i32
  }
  func.func @transform_3(%arg0: i32, %arg1: i32) -> (i32, i32, i32) {
    %c0_i32 = arith.constant 0 : i32
    %c0_i32_0 = arith.constant 0 : i32
    return %arg0, %c0_i32, %arg1 : i32, i32, i32
  }
}

</mosaic_0001>

<bundles_post_ra>
// kernel: _stack_layer_norm_3d.1
= control target key start
LH: loop header
LB: loop body
LE: loop exit
PB: predicated region body
PF: predicated region fallthrough
CT: control target
= control target key end

     0   :  { %8 = vsyncpa [#allocation3], 0  ;;  %s818_s0 = inlined_call_operand.hbm [shape: f32[2,8,256], index: 0, kind: input, shape index: {}, may-alias: {0,3}]   ;;  %s819_s1 = inlined_call_operand.vmem [shape: f32[8,1], index: 1, kind: input, shape index: {}]   ;;  %s820_s2 = inlined_call_operand.vmem [shape: f32[8,1], index: 2, kind: input, shape index: {}]   ;;  %s821_s3 = inlined_call_operand.hbm [shape: f32[2,8,256], index: 3, kind: output, shape index: {}, may-alias: {0,3}]  }
   0x1   :  { %10 = vsyncpa [#allocation3 + $0x1], 0 }
   0x2   :  { %11 = vsyncpa [#allocation4], 0 }
   0x3   :  { %13 = vsyncpa [#allocation4 + $0x1], 0  ;;  %s651_s12 = smov 0   ;;  %s653_s13 = smov 0  }
   0x4   :  { %s655_s14 = smov 0   ;;  %s657_s15 = smov 0  }
   0x5   :  { %s659_s16 = smov 0   ;;  %s661_s17 = smov 0  }
   0x6 LB: > { %s431_s18 = sadd.s32 4294967295, %s628_s17   ;;  %s432_s19 = sadd.s32 4294967294, %s628_s17   ;;  %s628_s17 = sphi %s661_s17, %s19_s17   ;;  %s624_s16 = sphi %s659_s16, %s830_s16   ;;  %s620_s15 = sphi %s657_s15, %s829_s15   ;;  %s616_s14 = sphi %s655_s14, %s828_s14   ;;  %s612_s13 = sphi %s653_s13, %s827_s13   ;;  %s608_s12 = sphi %s651_s12, %s826_s12  }
   0x7   : > { %s31_s20 = sadd.s32 1, %s624_s16  ;;  %s40_s21 = sadd.s32 1, %s616_s14 }
   0x8   : > { %p33_p0 = scmp.ge.s32.totalorder %s31_s20, 2  ;;  %p47_p1 = scmp.ne.s32.totalorder %s616_s14, %s612_s13 }
   0x9   : > { %p48_p2 = scmp.eq.s32.totalorder %s628_s17, 0  ;;  %p53_p3 = scmp.ne.s32.totalorder %s612_s13, %s608_s12 }
   0xa   : > { %s832_s20 = smov (%p33_p0, %s31_s20), 0  ;;  %p54_p5 = scmp.eq.s32.totalorder %s431_s18, 0 }
   0xb   : > { %p692_p4 = por %p48_p2, %p47_p1  ;;  %s35_s23 = ssub.s32 %s624_s16, %s832_s20 }
   0xc   : > { %p121_p6 = scmp.eq.s32.totalorder %s431_s18, 1  ;;  %p38_p7 = scmp.eq.s32.totalorder %s35_s23, 0 }
   0xd   : > { %p698_p8 = por %p54_p5, %p53_p3  ;;  %p127_p10 = scmp.eq.s32.totalorder %s432_s19, 1 }
   0xe   : > { %p702_p9 = por %p121_p6, %p47_p1  ;;  %p434_p12 = scmp.ge.s32.totalorder %s628_s17, 2 }
   0xf   : > { %s707_s26 = scalar_select %p38_p7, %s616_s14, %s40_s21  }
  0x10   : > { %p709_p11 = por %p127_p10, %p53_p3  ;;  %p460_p13 = scmp.lt.s32.totalorder %s628_s17, 2 }
  0x11   : > { %s153_s28 = sand.u32 1, %s616_s14   ;;  %s446_s30 = sshll.u32 %s624_s16, 4 }
  0x12   : > { %s435_s29 = sshll.u32 %s153_s28, 4  ;;  %s164_s6 = scalar_lea.hbm %s818_s0, %s446_s30 }
  0x13   : > { %s157_s7 = scalar_lea.vmem [#allocation2], %s435_s29  ;;  %s166_s9 = sshll.u32 %s164_s6, 4  ;;  %s167_s9 = int_to_ptr.hbm [resolvable:$true] %s166_s9 }
  0x14   : > { %s168_s8 = sshll.u32 %s157_s7, 4  ;;  %p453_p0 = pnand %p460_p13, %p692_p4  ;;  %s169_s8 = int_to_ptr.vmem [resolvable:$true] %s168_s8 }
  0x15   : > { %p438_p1 = scmp.ge.s32.totalorder %s628_s17, 1  ;;  %p173_p2 = scmp.lt.s32.totalorder %s628_s17, 3 }
  0x16   : > { %s154_s10 = scalar_lea.sflag [#allocation3], %s153_s28 }
  0x17   : > { %455 = dma.hbm_to_vmem [thread:$0]  (!%p453_p0), %s167_s9, 256, %s169_s8, %s154_s10  }
  0x18   : > { %p174_p3 = pnand %p438_p1, %p173_p2 }
  0x19   : > { %s725_s11 = sand.u32 (!%p174_p3), 1, %s612_s13  }
  0x1a   : > { %177 = sbr.rel (%p174_p3) target bundleno = 163 (0xa3), region = 32  ;;  %s439_s18 = sshll.u32 (!%p174_p3), %s725_s11, 4 }
  0x1b   : > { %s180_s19 = scalar_lea.sflag (!%p174_p3), [#allocation3], %s725_s11  ;;  %s183_s21 = scalar_lea.vmem (!%p174_p3), [#allocation2], %s439_s18 }
  0x1f   : > { %599 = dma.done.wait (%p698_p8), %s180_s19, 256  }
  0x20   : > { %601 = vsyncadd (%p698_p8), %s180_s19, 4294967040  ;;  %v630_v0 = vmov 0   ;;  %v308_v1 = vld [vmem:[%s819_s1] sm:$0xff]  ;;  %v211_v3 = vlaneseq  ;;  %v210_v6 = vld [vmem:[%s183_s21 + $0x8] sm:$0xff]  ;;  %s447_s24 = sshll.u32 %s620_s15, 4  ;;  %s206_s6 = scalar_lea.vmem [#allocation5], %s439_s18 }
  0x21   : > { %511 = vset.pattern.permute.xlu0 %v630_v0  ;;  %v309_v2 = vld [vmem:[%s820_s2] sm:$0xff]  ;;  %s342_s5 = scalar_lea.hbm %s821_s3, %s447_s24  ;;  %s344_s7 = sshll.u32 %s206_s6, 4  ;;  %s345_s7 = int_to_ptr.vmem [resolvable:$true] %s344_s7 }
  0x22   : > { %314 = vperm.xlu0 %511, %v308_v1   ;;  %v741_v4 = vshrl.u32 %v211_v3, 7  ;;  %v209_v5 = vld [vmem:[%s183_s21] sm:$0xff]  ;;  %s346_s8 = sshll.u32 %s342_s5, 4  ;;  %s329_s15 = scalar_lea.sflag [#allocation4], %s725_s11  ;;  %s347_s8 = int_to_ptr.hbm [resolvable:$true] %s346_s8 }
  0x23   : > { %s560_s9 = sshra.s32 %s347_s8, 4  ;;  %s566_s18 = scalar_lea.hbm %s821_s3, 32  ;;  %s561_s9 = int_to_ptr.hbm [resolvable:$true] %s560_s9 }
  0x24   : > { %vm213_vm0 = vcmp.lt.s32.totalorder %v741_v4, 4  ;;  %s562_s10 = scalar_lea.hbm %s561_s9, 16  ;;  %p567_p7 = scmp.lt.s32.totalorder %s561_s9, %s821_s3 }
  0x25   : > { %v214_v7 = vsel %vm213_vm0, %v209_v5, 0.0  ;;  %v215_v8 = vsel %vm213_vm0, %v210_v6, 0.0  ;;  %v228_v9 = vsel %vm213_vm0, 0.0, %v209_v5  ;;  %v229_v10 = vsel %vm213_vm0, 0.0, %v210_v6  ;;  %p563_p4 = scmp.ne.s32.totalorder %s561_s9, %s562_s10  ;;  %p568_p8 = scmp.lt.s32.totalorder %s566_s18, %s562_s10 }
  0x26   : > { %v216_v11 = vrot.slane %v214_v7, 4  ;;  %v222_v12 = vrot.slane %v215_v8, 4  ;;  %v230_v13 = vrot.slane %v228_v9, 4  ;;  %v236_v14 = vrot.slane %v229_v10, 4 }
  0x27   : > { %p564_p5 = pnand %p563_p4, %p702_p9  ;;  %p569_p10 = por %p568_p8, %p567_p7 }
  0x28   : > { %v217_v15 = vadd.f32 %v216_v11, %v214_v7  ;;  %v223_v16 = vadd.f32 %v222_v12, %v215_v8  ;;  %v231_v17 = vadd.f32 %v230_v13, %v228_v9  ;;  %v237_v18 = vadd.f32 %v236_v14, %v229_v10 }
  0x29   : > { %p565_p6 = pneg %p564_p5 }
  0x2a   : > { %321 = vperm.xlu0 %511, %v309_v2   ;;  %v218_v19 = vrot.slane %v217_v15, 2  ;;  %v224_v20 = vrot.slane %v223_v16, 2  ;;  %v232_v21 = vrot.slane %v231_v17, 2  ;;  %v238_v22 = vrot.slane %v237_v18, 2 }
  0x2b   : > { %p570_p13 = pnand %p569_p10, %p565_p6 }
  0x2c   : > { %v219_v23 = vadd.f32 %v218_v19, %v217_v15  ;;  %v225_v24 = vadd.f32 %v224_v20, %v223_v16  ;;  %v233_v25 = vadd.f32 %v232_v21, %v231_v17  ;;  %v239_v26 = vadd.f32 %v238_v22, %v237_v18 }
  0x2e   : > { %v220_v27 = vrot.slane %v219_v23, 1  ;;  %v226_v28 = vrot.slane %v225_v24, 1  ;;  %v234_v29 = vrot.slane %v233_v25, 1  ;;  %v240_v30 = vrot.slane %v239_v26, 1 }
  0x30   : > { %v221_v31 = vadd.f32 %v220_v27, %v219_v23  ;;  %v227_v32 = vadd.f32 %v226_v28, %v225_v24  ;;  %v235_v33 = vadd.f32 %v234_v29, %v233_v25  ;;  %v241_v34 = vadd.f32 %v240_v30, %v239_v26 }
  0x32   : > { %v242_v35 = vmul.f32 0.25, %v221_v31  ;;  %v243_v36 = vmul.f32 0.25, %v227_v32  ;;  %v244_v37 = vmul.f32 0.25, %v235_v33  ;;  %v245_v38 = vmul.f32 0.25, %v241_v34 }
  0x34   : > { %v246_v39 = vsel %vm213_vm0, %v242_v35, %v244_v37  ;;  %v247_v40 = vsel %vm213_vm0, %v243_v36, %v245_v38 }
  0x35   : > { %v756_v41 = vsub.f32 %v209_v5, %v246_v39  ;;  %v758_v42 = vsub.f32 %v210_v6, %v247_v40 }
  0x37   : > { %v250_v43 = vmul.f32 %v756_v41, %v756_v41  ;;  %v251_v44 = vmul.f32 %v758_v42, %v758_v42 }
  0x39   : > { %v252_v45 = vsel %vm213_vm0, %v250_v43, 0.0  ;;  %v268_v46 = vsel %vm213_vm0, 0.0, %v250_v43  ;;  %v253_v47 = vsel %vm213_vm0, %v251_v44, 0.0  ;;  %v269_v48 = vsel %vm213_vm0, 0.0, %v251_v44 }
  0x3a   : > { %v254_v49 = vrot.slane %v252_v45, 4  ;;  %v270_v50 = vrot.slane %v268_v46, 4  ;;  %v260_v51 = vrot.slane %v253_v47, 4  ;;  %v276_v52 = vrot.slane %v269_v48, 4 }
  0x3c   : > { %v255_v53 = vadd.f32 %v254_v49, %v252_v45  ;;  %v271_v54 = vadd.f32 %v270_v50, %v268_v46  ;;  %v261_v55 = vadd.f32 %v260_v51, %v253_v47  ;;  %v277_v56 = vadd.f32 %v276_v52, %v269_v48 }
  0x3e   : > { %v256_v57 = vrot.slane %v255_v53, 2  ;;  %v272_v58 = vrot.slane %v271_v54, 2  ;;  %v262_v59 = vrot.slane %v261_v55, 2  ;;  %v278_v60 = vrot.slane %v277_v56, 2 }
  0x40   : > { %v257_v61 = vadd.f32 %v256_v57, %v255_v53  ;;  %v273_v62 = vadd.f32 %v272_v58, %v271_v54  ;;  %v263_v63 = vadd.f32 %v262_v59, %v261_v55  ;;  %v279_v0 = vadd.f32 %v278_v60, %v277_v56 }
  0x42   : > { %v258_v1 = vrot.slane %v257_v61, 1  ;;  %v274_v2 = vrot.slane %v273_v62, 1  ;;  %v264_v3 = vrot.slane %v263_v63, 1  ;;  %v280_v5 = vrot.slane %v279_v0, 1 }
  0x44   : > { %v259_v6 = vadd.f32 %v258_v1, %v257_v61  ;;  %v275_v7 = vadd.f32 %v274_v2, %v273_v62  ;;  %v265_v8 = vadd.f32 %v264_v3, %v263_v63  ;;  %v281_v9 = vadd.f32 %v280_v5, %v279_v0 }
  0x46   : > { %v266_v10 = vmul.f32 0.25, %v259_v6  ;;  %v282_v11 = vmul.f32 0.25, %v275_v7  ;;  %v267_v12 = vmul.f32 0.25, %v265_v8  ;;  %v283_v13 = vmul.f32 0.25, %v281_v9 }
  0x48   : > { %v284_v14 = vsel %vm213_vm0, %v266_v10, %v282_v11  ;;  %v285_v15 = vsel %vm213_vm0, %v267_v12, %v283_v13 }
  0x49   : > { %v286_v16 = vadd.f32 1e-05, %v284_v14  ;;  %v287_v17 = vadd.f32 1e-05, %v285_v15 }
  0x4b   : > { %512 = vrsqrt.f32 %v286_v16  ;;  %vm294_vm1 = vweird.f32 %v286_v16  ;;  %vm304_vm3 = vweird.f32 %v287_v17 }
  0x4c   : > { %514 = vrsqrt.f32 %v287_v17 }
  0x51   : > { %v513_v18 = vpop.eup %512 }
  0x52   : > { %v515_v19 = vpop.eup %514  ;;  %v289_v20 = vmul.f32 %v513_v18, %v286_v16  ;;  %vm295_vm2 = vweird.f32 %v513_v18 }
  0x53   : > { %v299_v21 = vmul.f32 %v515_v19, %v287_v17  ;;  %vm305_vm4 = vweird.f32 %v515_v19  ;;  %vm296_vm5 = vmor %vm294_vm1, %vm295_vm2 }
  0x54   : > { %v290_v22 = vmul.f32 %v513_v18, %v289_v20  ;;  %vm306_vm6 = vmor %vm304_vm3, %vm305_vm4 }
  0x55   : > { %v300_v23 = vmul.f32 %v515_v19, %v299_v21 }
  0x56   : > { %v291_v24 = vmul.f32 0.5, %v290_v22 }
  0x57   : > { %v301_v25 = vmul.f32 0.5, %v300_v23 }
  0x58   : > { %v292_v26 = vsub.f32 1.5, %v291_v24 }
  0x59   : > { %v302_v27 = vsub.f32 1.5, %v301_v25 }
  0x5a   : > { %v293_v4 = vmul.f32 %v513_v18, %v292_v26 }
  0x5b   : > { %v303_v28 = vmul.f32 %v515_v19, %v302_v27 }
  0x5c   : > { %v297_v30 = vsel %vm296_vm5, %v513_v18, %v293_v4 }
  0x5d   : > { %v307_v31 = vsel %vm306_vm6, %v515_v19, %v303_v28  ;;  %v310_v32 = vmul.f32 %v297_v30, %v756_v41 }
  0x5e   : > { %v311_v33 = vmul.f32 %v307_v31, %v758_v42 }
  0x94   : > { %v315_v29 = vpop.permute.xlu0 %314 }
  0x95   : > { %v317_v34 = vmul.f32 %v315_v29, %v310_v32  ;;  %v318_v35 = vmul.f32 %v315_v29, %v311_v33 }
  0x9c   : > { %v322_v36 = vpop.permute.xlu0 %321 }
  0x9d   : > { %v324_v37 = vadd.f32 %v322_v36, %v317_v34  ;;  %v325_v38 = vadd.f32 %v322_v36, %v318_v35 }
  0x9f   : > { %326 = vst [vmem:[%s206_s6] sm:$0xff] %v324_v37 }
  0xa0   : > { %327 = vst [vmem:[%s206_s6 + $0x8] sm:$0xff] %v325_v38 }
  0xa1   : > { %573 = shalt.err (!%p570_p13)
}
  0xa2   : > { %450 = dma.vmem_to_hbm [thread:$0]  (%p702_p9), %s345_s7, 256, %s347_s8, %s329_s15  }
  0xa3 PF: > { %s358_s11 = sand.u32 1, %s608_s12   ;;  %p457_p0 = pnand %p434_p12, %p709_p11 }
  0xa4   : > { %s359_s28 = scalar_lea.sflag [#allocation4], %s358_s11 }
  0xa5   : > { %p458_p1 = pneg %p457_p0 }
  0xa7   : > { %603 = dma.done.wait (%p458_p1), %s359_s28, 256  }
  0xa8   : > { %605 = vsyncadd (%p458_p1), %s359_s28, 4294967040  ;;  %s19_s17 = sadd.s32 1, %s628_s17   ;;  %s826_s12 = smov %s612_s13 }
  0xa9   : > { %p16_p2 = scmp.ge.s32.totalorder %s19_s17, 4   ;;  %s827_s13 = smov %s616_s14 }
  0xaa   : > { %s828_s14 = smov %s707_s26  ;;  %s829_s15 = smov %s624_s16 }
  0xab   : > { %s830_s16 = smov %s832_s20  ;;  %18 = sbr.rel (!%p16_p2) target bundleno = 6 (0x6), region = 77 }
  0xb0   :  { %365 = vsyncpa [#allocation3], 1 }
  0xb1   :  { %367 = vsyncpa [#allocation3 + $0x1], 1 }
  0xb2   :  { %368 = vsyncpa [#allocation4], 1 }
  0xb3   :  { %370 = vsyncpa [#allocation4 + $0x1], 1 }

</bundles_post_ra>
